<compile_context>
chip_gen: v7x
topology: tpu7x:2x2x1
jax: 0.10.0
libtpu: 0.0.40
codegen_flags: <defaults>
</compile_context>

<pallas_src>
import jax
import jax.numpy as jnp
from jax.experimental import pallas as pl
from jax.experimental.pallas import tpu as pltpu

n_input = 2
n_hidden = 10
n_output = 2

# Offsets into the packed 1-D parameter array (row-major PyTorch layouts).
_W1_OFF = 0
_B1_OFF = _W1_OFF + n_hidden * n_input      # 20
_W2_OFF = _B1_OFF + n_hidden                # 30
_B2_OFF = _W2_OFF + n_output * n_hidden     # 50
_N_PARAMS = _B2_OFF + n_output              # 52


def mlp_kernel(p_ref, xt_ref, ot_ref):
    # xt_ref: (n_input, B_pad), batch on lanes.  p_ref: (52,) f32 in SMEM.
    xrows = [xt_ref[k:k + 1, :] for k in range(n_input)]      # n_input x (1, B)

    # Layer 1: h_i = relu(sum_k w1[i,k] * x_k + b1[i]) -- scalar(SMEM)*vector FMAs.
    h = []
    for i in range(n_hidden):
        acc = p_ref[_B1_OFF + i] + p_ref[_W1_OFF + n_input * i] * xrows[0]
        for k in range(1, n_input):
            acc = acc + p_ref[_W1_OFF + n_input * i + k] * xrows[k]
        h.append(jnp.maximum(acc, 0.0))                       # (1, B)

    # Layer 2: o_j = sum_i w2[j,i] * h_i + b2[j] -- scalar(SMEM)*vector FMAs.
    for j in range(n_output):
        o = p_ref[_B2_OFF + j] + p_ref[_W2_OFF + n_hidden * j] * h[0]
        for i in range(1, n_hidden):
            o = o + p_ref[_W2_OFF + n_hidden * j + i] * h[i]
        ot_ref[j:j + 1, :] = o.astype(ot_ref.dtype)           # lane-dense row store


def net_forward_t(xt_padded, params_flat):
    """Transposed forward: (n_input, B_pad) -> (n_output, B_pad); B_pad % 128 == 0."""
    b_pad = xt_padded.shape[1]
    return pl.pallas_call(
        mlp_kernel,
        out_shape=jax.ShapeDtypeStruct((n_output, b_pad), jnp.float32),
        in_specs=[
            pl.BlockSpec(memory_space=pltpu.MemorySpace.SMEM),   # packed params
            pl.BlockSpec(memory_space=pltpu.MemorySpace.VMEM),   # xt (batch on lanes)
        ],
        out_specs=pl.BlockSpec(memory_space=pltpu.MemorySpace.VMEM),
    )(params_flat, xt_padded)


def prepare_params(w1, b1, w2, b2):
    """One-time packing of all parameters into a single flat f32 array (SMEM operand)."""
    flat = jnp.concatenate(
        [w1.reshape(-1), b1.reshape(-1), w2.reshape(-1), b2.reshape(-1)]
    ).astype(jnp.float32)
    assert flat.shape == (_N_PARAMS,)
    return flat


@jax.jit
def net_forward(x, params_flat):
    """PyTorch-semantics forward: x (B, n_input) -> (B, n_output).

    Transpose, lane-padding to a multiple of 128, the pallas_call and the final
    slice/transpose are all fused under this single jit (no standalone HLO ops
    around the kernel in the hot path).
    """
    b = x.shape[0]
    b_pad = ((b + 127) // 128) * 128
    xt = jnp.pad(x.T, ((0, 0), (0, b_pad - b)))              # (n_input, B_pad)
    out_t = net_forward_t(xt, params_flat)                   # (n_output, B_pad)
    return out_t[:, :b].T                                    # drop padded lanes


if __name__ == "__main__":
    key = jax.random.PRNGKey(0)
    k_x0, k_x1, k_w1, k_b1, k_w2, k_b2 = jax.random.split(key, 6)

    # Mirror the reference script's data: 100 points around +2, 100 around -2.
    x0 = 2.0 + jax.random.normal(k_x0, (100, n_input), dtype=jnp.float32)
    x1 = -2.0 + jax.random.normal(k_x1, (100, n_input), dtype=jnp.float32)
    x = jnp.concatenate([x0, x1], axis=0)              # (200, 2)

    # PyTorch Linear default init: U(-1/sqrt(fan_in), 1/sqrt(fan_in))
    lim1 = 1.0 / jnp.sqrt(jnp.float32(n_input))
    lim2 = 1.0 / jnp.sqrt(jnp.float32(n_hidden))
    w1 = jax.random.uniform(k_w1, (n_hidden, n_input), jnp.float32, -lim1, lim1)
    b1 = jax.random.uniform(k_b1, (n_hidden,), jnp.float32, -lim1, lim1)
    w2 = jax.random.uniform(k_w2, (n_output, n_hidden), jnp.float32, -lim2, lim2)
    b2 = jax.random.uniform(k_b2, (n_output,), jnp.float32, -lim2, lim2)

    params_flat = prepare_params(w1, b1, w2, b2)       # once, outside hot path

    out = net_forward(x, params_flat)                  # (200, 2)
    out = jax.block_until_ready(out)

    # Pure-JAX reference (PyTorch semantics: relu(x @ W1.T + b1) @ W2.T + b2)
    ref = jnp.maximum(x @ w1.T + b1, 0.0) @ w2.T + b2
    assert out.shape == (200, n_output)
    assert jnp.allclose(out, ref, atol=1e-5), "mismatch vs reference"

    print("KERNEL_OK")
</pallas_src>

<mosaic_0001>
module attributes {stable_mosaic.version = 11 : i64} {
  func.func @mlp_kernel(%arg0: memref<52xf32, #tpu.memory_space<smem>>, %arg1: memref<2x256xf32, #tpu.memory_space<vmem>>, %arg2: memref<2x256xf32, #tpu.memory_space<vmem>>) attributes {dimension_semantics = [], scalar_prefetch = 0 : i64, scratch_operands = 0 : i64, tpu.core_type = #tpu.core_type<tc>} {
    %c0 = arith.constant 0 : index
    %c0_0 = arith.constant 0 : index
    %0 = vector.load %arg1[%c0, %c0_0] : memref<2x256xf32, #tpu.memory_space<vmem>>, vector<1x256xf32>
    %c1 = arith.constant 1 : index
    %c0_1 = arith.constant 0 : index
    %1 = vector.load %arg1[%c1, %c0_1] : memref<2x256xf32, #tpu.memory_space<vmem>>, vector<1x256xf32>
    %c20 = arith.constant 20 : index
    %2 = memref.load %arg0[%c20] : memref<52xf32, #tpu.memory_space<smem>>
    %c0_2 = arith.constant 0 : index
    %3 = memref.load %arg0[%c0_2] : memref<52xf32, #tpu.memory_space<smem>>
    %4 = vector.broadcast %3 : f32 to vector<1x256xf32>
    %5 = arith.mulf %4, %0 : vector<1x256xf32>
    %6 = vector.broadcast %2 : f32 to vector<1x256xf32>
    %7 = arith.addf %6, %5 : vector<1x256xf32>
    %c1_3 = arith.constant 1 : index
    %8 = memref.load %arg0[%c1_3] : memref<52xf32, #tpu.memory_space<smem>>
    %9 = vector.broadcast %8 : f32 to vector<1x256xf32>
    %10 = arith.mulf %9, %1 : vector<1x256xf32>
    %11 = arith.addf %7, %10 : vector<1x256xf32>
    %cst = arith.constant 0.000000e+00 : f32
    %12 = vector.broadcast %cst : f32 to vector<1x256xf32>
    %13 = arith.maximumf %11, %12 : vector<1x256xf32>
    %c21 = arith.constant 21 : index
    %14 = memref.load %arg0[%c21] : memref<52xf32, #tpu.memory_space<smem>>
    %c2 = arith.constant 2 : index
    %15 = memref.load %arg0[%c2] : memref<52xf32, #tpu.memory_space<smem>>
    %16 = vector.broadcast %15 : f32 to vector<1x256xf32>
    %17 = arith.mulf %16, %0 : vector<1x256xf32>
    %18 = vector.broadcast %14 : f32 to vector<1x256xf32>
    %19 = arith.addf %18, %17 : vector<1x256xf32>
    %c3 = arith.constant 3 : index
    %20 = memref.load %arg0[%c3] : memref<52xf32, #tpu.memory_space<smem>>
    %21 = vector.broadcast %20 : f32 to vector<1x256xf32>
    %22 = arith.mulf %21, %1 : vector<1x256xf32>
    %23 = arith.addf %19, %22 : vector<1x256xf32>
    %cst_4 = arith.constant 0.000000e+00 : f32
    %24 = vector.broadcast %cst_4 : f32 to vector<1x256xf32>
    %25 = arith.maximumf %23, %24 : vector<1x256xf32>
    %c22 = arith.constant 22 : index
    %26 = memref.load %arg0[%c22] : memref<52xf32, #tpu.memory_space<smem>>
    %c4 = arith.constant 4 : index
    %27 = memref.load %arg0[%c4] : memref<52xf32, #tpu.memory_space<smem>>
    %28 = vector.broadcast %27 : f32 to vector<1x256xf32>
    %29 = arith.mulf %28, %0 : vector<1x256xf32>
    %30 = vector.broadcast %26 : f32 to vector<1x256xf32>
    %31 = arith.addf %30, %29 : vector<1x256xf32>
    %c5 = arith.constant 5 : index
    %32 = memref.load %arg0[%c5] : memref<52xf32, #tpu.memory_space<smem>>
    %33 = vector.broadcast %32 : f32 to vector<1x256xf32>
    %34 = arith.mulf %33, %1 : vector<1x256xf32>
    %35 = arith.addf %31, %34 : vector<1x256xf32>
    %cst_5 = arith.constant 0.000000e+00 : f32
    %36 = vector.broadcast %cst_5 : f32 to vector<1x256xf32>
    %37 = arith.maximumf %35, %36 : vector<1x256xf32>
    %c23 = arith.constant 23 : index
    %38 = memref.load %arg0[%c23] : memref<52xf32, #tpu.memory_space<smem>>
    %c6 = arith.constant 6 : index
    %39 = memref.load %arg0[%c6] : memref<52xf32, #tpu.memory_space<smem>>
    %40 = vector.broadcast %39 : f32 to vector<1x256xf32>
    %41 = arith.mulf %40, %0 : vector<1x256xf32>
    %42 = vector.broadcast %38 : f32 to vector<1x256xf32>
    %43 = arith.addf %42, %41 : vector<1x256xf32>
    %c7 = arith.constant 7 : index
    %44 = memref.load %arg0[%c7] : memref<52xf32, #tpu.memory_space<smem>>
    %45 = vector.broadcast %44 : f32 to vector<1x256xf32>
    %46 = arith.mulf %45, %1 : vector<1x256xf32>
    %47 = arith.addf %43, %46 : vector<1x256xf32>
    %cst_6 = arith.constant 0.000000e+00 : f32
    %48 = vector.broadcast %cst_6 : f32 to vector<1x256xf32>
    %49 = arith.maximumf %47, %48 : vector<1x256xf32>
    %c24 = arith.constant 24 : index
    %50 = memref.load %arg0[%c24] : memref<52xf32, #tpu.memory_space<smem>>
    %c8 = arith.constant 8 : index
    %51 = memref.load %arg0[%c8] : memref<52xf32, #tpu.memory_space<smem>>
    %52 = vector.broadcast %51 : f32 to vector<1x256xf32>
    %53 = arith.mulf %52, %0 : vector<1x256xf32>
    %54 = vector.broadcast %50 : f32 to vector<1x256xf32>
    %55 = arith.addf %54, %53 : vector<1x256xf32>
    %c9 = arith.constant 9 : index
    %56 = memref.load %arg0[%c9] : memref<52xf32, #tpu.memory_space<smem>>
    %57 = vector.broadcast %56 : f32 to vector<1x256xf32>
    %58 = arith.mulf %57, %1 : vector<1x256xf32>
    %59 = arith.addf %55, %58 : vector<1x256xf32>
    %cst_7 = arith.constant 0.000000e+00 : f32
    %60 = vector.broadcast %cst_7 : f32 to vector<1x256xf32>
    %61 = arith.maximumf %59, %60 : vector<1x256xf32>
    %c25 = arith.constant 25 : index
    %62 = memref.load %arg0[%c25] : memref<52xf32, #tpu.memory_space<smem>>
    %c10 = arith.constant 10 : index
    %63 = memref.load %arg0[%c10] : memref<52xf32, #tpu.memory_space<smem>>
    %64 = vector.broadcast %63 : f32 to vector<1x256xf32>
    %65 = arith.mulf %64, %0 : vector<1x256xf32>
    %66 = vector.broadcast %62 : f32 to vector<1x256xf32>
    %67 = arith.addf %66, %65 : vector<1x256xf32>
    %c11 = arith.constant 11 : index
    %68 = memref.load %arg0[%c11] : memref<52xf32, #tpu.memory_space<smem>>
    %69 = vector.broadcast %68 : f32 to vector<1x256xf32>
    %70 = arith.mulf %69, %1 : vector<1x256xf32>
    %71 = arith.addf %67, %70 : vector<1x256xf32>
    %cst_8 = arith.constant 0.000000e+00 : f32
    %72 = vector.broadcast %cst_8 : f32 to vector<1x256xf32>
    %73 = arith.maximumf %71, %72 : vector<1x256xf32>
    %c26 = arith.constant 26 : index
    %74 = memref.load %arg0[%c26] : memref<52xf32, #tpu.memory_space<smem>>
    %c12 = arith.constant 12 : index
    %75 = memref.load %arg0[%c12] : memref<52xf32, #tpu.memory_space<smem>>
    %76 = vector.broadcast %75 : f32 to vector<1x256xf32>
    %77 = arith.mulf %76, %0 : vector<1x256xf32>
    %78 = vector.broadcast %74 : f32 to vector<1x256xf32>
    %79 = arith.addf %78, %77 : vector<1x256xf32>
    %c13 = arith.constant 13 : index
    %80 = memref.load %arg0[%c13] : memref<52xf32, #tpu.memory_space<smem>>
    %81 = vector.broadcast %80 : f32 to vector<1x256xf32>
    %82 = arith.mulf %81, %1 : vector<1x256xf32>
    %83 = arith.addf %79, %82 : vector<1x256xf32>
    %cst_9 = arith.constant 0.000000e+00 : f32
    %84 = vector.broadcast %cst_9 : f32 to vector<1x256xf32>
    %85 = arith.maximumf %83, %84 : vector<1x256xf32>
    %c27 = arith.constant 27 : index
    %86 = memref.load %arg0[%c27] : memref<52xf32, #tpu.memory_space<smem>>
    %c14 = arith.constant 14 : index
    %87 = memref.load %arg0[%c14] : memref<52xf32, #tpu.memory_space<smem>>
    %88 = vector.broadcast %87 : f32 to vector<1x256xf32>
    %89 = arith.mulf %88, %0 : vector<1x256xf32>
    %90 = vector.broadcast %86 : f32 to vector<1x256xf32>
    %91 = arith.addf %90, %89 : vector<1x256xf32>
    %c15 = arith.constant 15 : index
    %92 = memref.load %arg0[%c15] : memref<52xf32, #tpu.memory_space<smem>>
    %93 = vector.broadcast %92 : f32 to vector<1x256xf32>
    %94 = arith.mulf %93, %1 : vector<1x256xf32>
    %95 = arith.addf %91, %94 : vector<1x256xf32>
    %cst_10 = arith.constant 0.000000e+00 : f32
    %96 = vector.broadcast %cst_10 : f32 to vector<1x256xf32>
    %97 = arith.maximumf %95, %96 : vector<1x256xf32>
    %c28 = arith.constant 28 : index
    %98 = memref.load %arg0[%c28] : memref<52xf32, #tpu.memory_space<smem>>
    %c16 = arith.constant 16 : index
    %99 = memref.load %arg0[%c16] : memref<52xf32, #tpu.memory_space<smem>>
    %100 = vector.broadcast %99 : f32 to vector<1x256xf32>
    %101 = arith.mulf %100, %0 : vector<1x256xf32>
    %102 = vector.broadcast %98 : f32 to vector<1x256xf32>
    %103 = arith.addf %102, %101 : vector<1x256xf32>
    %c17 = arith.constant 17 : index
    %104 = memref.load %arg0[%c17] : memref<52xf32, #tpu.memory_space<smem>>
    %105 = vector.broadcast %104 : f32 to vector<1x256xf32>
    %106 = arith.mulf %105, %1 : vector<1x256xf32>
    %107 = arith.addf %103, %106 : vector<1x256xf32>
    %cst_11 = arith.constant 0.000000e+00 : f32
    %108 = vector.broadcast %cst_11 : f32 to vector<1x256xf32>
    %109 = arith.maximumf %107, %108 : vector<1x256xf32>
    %c29 = arith.constant 29 : index
    %110 = memref.load %arg0[%c29] : memref<52xf32, #tpu.memory_space<smem>>
    %c18 = arith.constant 18 : index
    %111 = memref.load %arg0[%c18] : memref<52xf32, #tpu.memory_space<smem>>
    %112 = vector.broadcast %111 : f32 to vector<1x256xf32>
    %113 = arith.mulf %112, %0 : vector<1x256xf32>
    %114 = vector.broadcast %110 : f32 to vector<1x256xf32>
    %115 = arith.addf %114, %113 : vector<1x256xf32>
    %c19 = arith.constant 19 : index
    %116 = memref.load %arg0[%c19] : memref<52xf32, #tpu.memory_space<smem>>
    %117 = vector.broadcast %116 : f32 to vector<1x256xf32>
    %118 = arith.mulf %117, %1 : vector<1x256xf32>
    %119 = arith.addf %115, %118 : vector<1x256xf32>
    %cst_12 = arith.constant 0.000000e+00 : f32
    %120 = vector.broadcast %cst_12 : f32 to vector<1x256xf32>
    %121 = arith.maximumf %119, %120 : vector<1x256xf32>
    %c50 = arith.constant 50 : index
    %122 = memref.load %arg0[%c50] : memref<52xf32, #tpu.memory_space<smem>>
    %c30 = arith.constant 30 : index
    %123 = memref.load %arg0[%c30] : memref<52xf32, #tpu.memory_space<smem>>
    %124 = vector.broadcast %123 : f32 to vector<1x256xf32>
    %125 = arith.mulf %124, %13 : vector<1x256xf32>
    %126 = vector.broadcast %122 : f32 to vector<1x256xf32>
    %127 = arith.addf %126, %125 : vector<1x256xf32>
    %c31 = arith.constant 31 : index
    %128 = memref.load %arg0[%c31] : memref<52xf32, #tpu.memory_space<smem>>
    %129 = vector.broadcast %128 : f32 to vector<1x256xf32>
    %130 = arith.mulf %129, %25 : vector<1x256xf32>
    %131 = arith.addf %127, %130 : vector<1x256xf32>
    %c32 = arith.constant 32 : index
    %132 = memref.load %arg0[%c32] : memref<52xf32, #tpu.memory_space<smem>>
    %133 = vector.broadcast %132 : f32 to vector<1x256xf32>
    %134 = arith.mulf %133, %37 : vector<1x256xf32>
    %135 = arith.addf %131, %134 : vector<1x256xf32>
    %c33 = arith.constant 33 : index
    %136 = memref.load %arg0[%c33] : memref<52xf32, #tpu.memory_space<smem>>
    %137 = vector.broadcast %136 : f32 to vector<1x256xf32>
    %138 = arith.mulf %137, %49 : vector<1x256xf32>
    %139 = arith.addf %135, %138 : vector<1x256xf32>
    %c34 = arith.constant 34 : index
    %140 = memref.load %arg0[%c34] : memref<52xf32, #tpu.memory_space<smem>>
    %141 = vector.broadcast %140 : f32 to vector<1x256xf32>
    %142 = arith.mulf %141, %61 : vector<1x256xf32>
    %143 = arith.addf %139, %142 : vector<1x256xf32>
    %c35 = arith.constant 35 : index
    %144 = memref.load %arg0[%c35] : memref<52xf32, #tpu.memory_space<smem>>
    %145 = vector.broadcast %144 : f32 to vector<1x256xf32>
    %146 = arith.mulf %145, %73 : vector<1x256xf32>
    %147 = arith.addf %143, %146 : vector<1x256xf32>
    %c36 = arith.constant 36 : index
    %148 = memref.load %arg0[%c36] : memref<52xf32, #tpu.memory_space<smem>>
    %149 = vector.broadcast %148 : f32 to vector<1x256xf32>
    %150 = arith.mulf %149, %85 : vector<1x256xf32>
    %151 = arith.addf %147, %150 : vector<1x256xf32>
    %c37 = arith.constant 37 : index
    %152 = memref.load %arg0[%c37] : memref<52xf32, #tpu.memory_space<smem>>
    %153 = vector.broadcast %152 : f32 to vector<1x256xf32>
    %154 = arith.mulf %153, %97 : vector<1x256xf32>
    %155 = arith.addf %151, %154 : vector<1x256xf32>
    %c38 = arith.constant 38 : index
    %156 = memref.load %arg0[%c38] : memref<52xf32, #tpu.memory_space<smem>>
    %157 = vector.broadcast %156 : f32 to vector<1x256xf32>
    %158 = arith.mulf %157, %109 : vector<1x256xf32>
    %159 = arith.addf %155, %158 : vector<1x256xf32>
    %c39 = arith.constant 39 : index
    %160 = memref.load %arg0[%c39] : memref<52xf32, #tpu.memory_space<smem>>
    %161 = vector.broadcast %160 : f32 to vector<1x256xf32>
    %162 = arith.mulf %161, %121 : vector<1x256xf32>
    %163 = arith.addf %159, %162 : vector<1x256xf32>
    %c0_13 = arith.constant 0 : index
    %c0_14 = arith.constant 0 : index
    %164 = vector.load %arg2[%c0_13, %c0_14] : memref<2x256xf32, #tpu.memory_space<vmem>>, vector<1x256xf32>
    tpu.vector_store %arg2[%c0_13, %c0_14], %163 {strides = array<i32>} : memref<2x256xf32, #tpu.memory_space<vmem>>, vector<1x256xf32>,
    %c51 = arith.constant 51 : index
    %165 = memref.load %arg0[%c51] : memref<52xf32, #tpu.memory_space<smem>>
    %c40 = arith.constant 40 : index
    %166 = memref.load %arg0[%c40] : memref<52xf32, #tpu.memory_space<smem>>
    %167 = vector.broadcast %166 : f32 to vector<1x256xf32>
    %168 = arith.mulf %167, %13 : vector<1x256xf32>
    %169 = vector.broadcast %165 : f32 to vector<1x256xf32>
    %170 = arith.addf %169, %168 : vector<1x256xf32>
    %c41 = arith.constant 41 : index
    %171 = memref.load %arg0[%c41] : memref<52xf32, #tpu.memory_space<smem>>
    %172 = vector.broadcast %171 : f32 to vector<1x256xf32>
    %173 = arith.mulf %172, %25 : vector<1x256xf32>
    %174 = arith.addf %170, %173 : vector<1x256xf32>
    %c42 = arith.constant 42 : index
    %175 = memref.load %arg0[%c42] : memref<52xf32, #tpu.memory_space<smem>>
    %176 = vector.broadcast %175 : f32 to vector<1x256xf32>
    %177 = arith.mulf %176, %37 : vector<1x256xf32>
    %178 = arith.addf %174, %177 : vector<1x256xf32>
    %c43 = arith.constant 43 : index
    %179 = memref.load %arg0[%c43] : memref<52xf32, #tpu.memory_space<smem>>
    %180 = vector.broadcast %179 : f32 to vector<1x256xf32>
    %181 = arith.mulf %180, %49 : vector<1x256xf32>
    %182 = arith.addf %178, %181 : vector<1x256xf32>
    %c44 = arith.constant 44 : index
    %183 = memref.load %arg0[%c44] : memref<52xf32, #tpu.memory_space<smem>>
    %184 = vector.broadcast %183 : f32 to vector<1x256xf32>
    %185 = arith.mulf %184, %61 : vector<1x256xf32>
    %186 = arith.addf %182, %185 : vector<1x256xf32>
    %c45 = arith.constant 45 : index
    %187 = memref.load %arg0[%c45] : memref<52xf32, #tpu.memory_space<smem>>
    %188 = vector.broadcast %187 : f32 to vector<1x256xf32>
    %189 = arith.mulf %188, %73 : vector<1x256xf32>
    %190 = arith.addf %186, %189 : vector<1x256xf32>
    %c46 = arith.constant 46 : index
    %191 = memref.load %arg0[%c46] : memref<52xf32, #tpu.memory_space<smem>>
    %192 = vector.broadcast %191 : f32 to vector<1x256xf32>
    %193 = arith.mulf %192, %85 : vector<1x256xf32>
    %194 = arith.addf %190, %193 : vector<1x256xf32>
    %c47 = arith.constant 47 : index
    %195 = memref.load %arg0[%c47] : memref<52xf32, #tpu.memory_space<smem>>
    %196 = vector.broadcast %195 : f32 to vector<1x256xf32>
    %197 = arith.mulf %196, %97 : vector<1x256xf32>
    %198 = arith.addf %194, %197 : vector<1x256xf32>
    %c48 = arith.constant 48 : index
    %199 = memref.load %arg0[%c48] : memref<52xf32, #tpu.memory_space<smem>>
    %200 = vector.broadcast %199 : f32 to vector<1x256xf32>
    %201 = arith.mulf %200, %109 : vector<1x256xf32>
    %202 = arith.addf %198, %201 : vector<1x256xf32>
    %c49 = arith.constant 49 : index
    %203 = memref.load %arg0[%c49] : memref<52xf32, #tpu.memory_space<smem>>
    %204 = vector.broadcast %203 : f32 to vector<1x256xf32>
    %205 = arith.mulf %204, %121 : vector<1x256xf32>
    %206 = arith.addf %202, %205 : vector<1x256xf32>
    %c1_15 = arith.constant 1 : index
    %c0_16 = arith.constant 0 : index
    %207 = vector.load %arg2[%c1_15, %c0_16] : memref<2x256xf32, #tpu.memory_space<vmem>>, vector<1x256xf32>
    tpu.vector_store %arg2[%c1_15, %c0_16], %206 {strides = array<i32>} : memref<2x256xf32, #tpu.memory_space<vmem>>, vector<1x256xf32>,
    return
  }
}

</mosaic_0001>

<bundles_post_ra>
// kernel: net_forward.1
= control target key start
LH: loop header
LB: loop body
LE: loop exit
PB: predicated region body
PF: predicated region fallthrough
CT: control target
= control target key end

     0   :  { %7 = vsyncpa [#allocation3], 0  ;;  %s541_s0 = inlined_call_operand.vmem [shape: f32[52], index: 0, kind: input, shape index: {}]   ;;  %s542_s1 = inlined_call_operand.vmem [shape: f32[2,256], index: 1, kind: input, shape index: {}]   ;;  %s543_s2 = inlined_call_operand.vmem [shape: f32[2,256], index: 2, kind: output, shape index: {}]  }
   0x1   :  { %s14_s11 = sshll.u32 %s541_s0, 4  ;;  %s15_s11 = int_to_ptr.vmem [resolvable:$true] %s14_s11 }
   0x2   :  { %s287_s12 = scalar_lea.vmem %s15_s11, 16  ;;  %p292_p1 = scmp.lt.s32.totalorder %s15_s11, %s15_s11 }
   0x3   :  { %p288_p0 = scmp.ne.s32.totalorder %s15_s11, %s287_s12  ;;  %p293_p2 = scmp.lt.s32.totalorder %s287_s12, %s287_s12 }
   0x5   :  { %p294_p3 = por %p293_p2, %p292_p1 }
   0x7   :  { %p295_p4 = pnand %p294_p3, %p288_p0 }
   0x9   :  { %298 = shalt.err (!%p295_p4)
}
   0xa   :  { %s301_s13 = smov [#allocation2]  }
   0xb   :  { %17 = dma.vmem_to_smem %s15_s11, 16, %s301_s13, [#allocation3]  }
   0xc   :  { %299 = dma.done.wait [#allocation3], 16  }
   0xd   :  { %300 = vsyncadd [#allocation3], 4294967280 }
   0xe   :  { %23 = sfence }
   0xf   :  { %s320_s14 = sld [smem:[#allocation2 + $0x14]]  ;;  %s28_s15 = sld [smem:[#allocation2]]  ;;  %v329_v0 = vld [vmem:[%s542_s1] ss:$2 sm:$0x3] }
  0x10   :  { %s322_s16 = sld [smem:[#allocation2 + $0x1]]  ;;  %s324_s17 = sld [smem:[#allocation2 + $0x15]]  ;;  %v346_v1 = vld [vmem:[%s542_s1 + $0x1] ss:$2 sm:$0x3] }
  0x11   :  { %s237_s19 = sld [smem:[#allocation2 + $0x2]]  ;;  %s331_s20 = sld [smem:[#allocation2 + $0x3]] }
  0x12   :  { %s333_s21 = sld [smem:[#allocation2 + $0x16]]  ;;  %s240_s22 = sld [smem:[#allocation2 + $0x4]] }
  0x13   :  { %s335_s23 = sld [smem:[#allocation2 + $0x5]]  ;;  %s337_s24 = sld [smem:[#allocation2 + $0x17]] }
  0x14   :  { %s339_s25 = sld [smem:[#allocation2 + $0x6]]  ;;  %s341_s26 = sld [smem:[#allocation2 + $0x7]] }
  0x15   :  { %v29_v2 = vstv %s28_s15  ;;  %s348_s29 = sld [smem:[#allocation2 + $0x18]]  ;;  %s353_s3 = sld [smem:[#allocation2 + $0x9]]  ;;  %v31_v4 = vstv %s320_s14 }
  0x16   :  { %s350_s30 = sld [smem:[#allocation2 + $0x8]]  ;;  %v30_v3 = vmul.f32 %v29_v2, %v329_v0  ;;  %s355_s4 = sld [smem:[#allocation2 + $0x19]]  ;;  %v34_v5 = vstv %s322_s16  ;;  %v42_v10 = vstv %s324_s17 }
  0x17   :  { %v40_v6 = vstv %s237_s19  ;;  %s359_s1 = sld [smem:[#allocation2 + $0xa]]  ;;  %s361_s5 = sld [smem:[#allocation2 + $0xb]]  ;;  %v45_v8 = vstv %s331_s20  ;;  %v35_v15 = vmul.f32 %v346_v1, %v34_v5 }
  0x18   :  { %v41_v7 = vmul.f32 %v40_v6, %v329_v0  ;;  %v51_v9 = vstv %s240_s22  ;;  %s365_s6 = sld [smem:[#allocation2 + $0x1a]]  ;;  %s367_s7 = sld [smem:[#allocation2 + $0xc]]  ;;  %v53_v12 = vstv %s333_s21  ;;  %v32_v14 = vadd.f32 %v31_v4, %v30_v3 }
  0x19   :  { %v52_v11 = vmul.f32 %v51_v9, %v329_v0  ;;  %v56_v13 = vstv %s335_s23  ;;  %s373_s8 = sld [smem:[#allocation2 + $0xd]]  ;;  %v64_v17 = vstv %s337_s24  ;;  %s378_s9 = sld [smem:[#allocation2 + $0x1b]]  ;;  %v46_v18 = vmul.f32 %v346_v1, %v45_v8 }
  0x1a   :  { %v62_v16 = vstv %s339_s25  ;;  %s380_s10 = sld [smem:[#allocation2 + $0xe]]  ;;  %v67_v20 = vstv %s341_s26  ;;  %v43_v22 = vadd.f32 %v42_v10, %v41_v7  ;;  %v57_v24 = vmul.f32 %v346_v1, %v56_v13  ;;  %s388_s11 = sld [smem:[#allocation2 + $0xf]] }
  0x1b   :  { %v63_v19 = vmul.f32 %v62_v16, %v329_v0  ;;  %v54_v23 = vadd.f32 %v53_v12, %v52_v11  ;;  %s390_s12 = sld [smem:[#allocation2 + $0x10]]  ;;  %v68_v27 = vmul.f32 %v346_v1, %v67_v20  ;;  %v75_v28 = vstv %s348_s29  ;;  %s395_s13 = sld [smem:[#allocation2 + $0x1c]] }
  0x1c   :  { %v73_v21 = vstv %s350_s30  ;;  %v78_v29 = vstv %s353_s3  ;;  %s399_s14 = sld [smem:[#allocation2 + $0x11]]  ;;  %s401_s15 = sld [smem:[#allocation2 + $0x12]]  ;;  %v403_v33 = vadd.f32 %v35_v15, %v32_v14  ;;  %v86_v35 = vstv %s355_s4 }
  0x1d   :  { %v74_v25 = vmul.f32 %v73_v21, %v329_v0  ;;  %v65_v26 = vadd.f32 %v64_v17, %v63_v19  ;;  %v79_v31 = vmul.f32 %v346_v1, %v78_v29  ;;  %v84_v32 = vstv %s359_s1  ;;  %s407_s16 = sld [smem:[#allocation2 + $0x1d]]  ;;  %s409_s17 = sld [smem:[#allocation2 + $0x13]] }
  0x1e   :  { %v85_v34 = vmul.f32 %v84_v32, %v329_v0  ;;  %v411_v36 = vadd.f32 %v46_v18, %v43_v22  ;;  %v89_v37 = vstv %s361_s5  ;;  %v95_v38 = vstv %s367_s7  ;;  %s416_s0 = sld [smem:[#allocation2 + $0x32]]  ;;  %s418_s18 = sld [smem:[#allocation2 + $0x1e]] }
  0x1f   :  { %v76_v30 = vadd.f32 %v75_v28, %v74_v25  ;;  %v97_v39 = vstv %s365_s6  ;;  %v420_v40 = vadd.f32 %v57_v24, %v54_v23  ;;  %v422_v41 = vadd.f32 %v68_v27, %v65_v26  ;;  %s427_s19 = sld [smem:[#allocation2 + $0x1f]]  ;;  %s432_s20 = sld [smem:[#allocation2 + $0x20]] }
  0x20   :  { %v96_v43 = vmul.f32 %v95_v38, %v329_v0  ;;  %v87_v44 = vadd.f32 %v86_v35, %v85_v34  ;;  %v100_v45 = vstv %s373_s8  ;;  %v106_v46 = vstv %s380_s10  ;;  %s434_s21 = sld [smem:[#allocation2 + $0x21]]  ;;  %s443_s22 = sld [smem:[#allocation2 + $0x22]] }
  0x21   :  { %v424_v42 = vadd.f32 %v79_v31, %v76_v30  ;;  %v108_v47 = vstv %s378_s9  ;;  %v90_v48 = vmul.f32 %v346_v1, %v89_v37  ;;  %v101_v50 = vmul.f32 %v346_v1, %v100_v45  ;;  %s452_s23 = sld [smem:[#allocation2 + $0x23]]  ;;  %s454_s24 = sld [smem:[#allocation2 + $0x24]] }
  0x22   :  { %v98_v49 = vadd.f32 %v97_v39, %v96_v43  ;;  %v107_v51 = vmul.f32 %v106_v46, %v329_v0  ;;  %v37_v52 = vmax.f32 %v403_v33, 0.0  ;;  %v48_v53 = vmax.f32 %v411_v36, 0.0  ;;  %s462_s25 = sld [smem:[#allocation2 + $0x33]]  ;;  %s464_s26 = sld [smem:[#allocation2 + $0x28]] }
  0x23   :  { %v111_v54 = vstv %s388_s11  ;;  %v117_v55 = vstv %s390_s12  ;;  %v59_v56 = vmax.f32 %v420_v40, 0.0  ;;  %v70_v57 = vmax.f32 %v422_v41, 0.0  ;;  %s470_s27 = sld [smem:[#allocation2 + $0x29]]  ;;  %s472_s28 = sld [smem:[#allocation2 + $0x2a]] }
  0x24   :  { %v109_v58 = vadd.f32 %v108_v47, %v107_v51  ;;  %v112_v59 = vmul.f32 %v346_v1, %v111_v54  ;;  %v81_v60 = vmax.f32 %v424_v42, 0.0  ;;  %v118_v61 = vmul.f32 %v117_v55, %v329_v0  ;;  %s484_s29 = sld [smem:[#allocation2 + $0x25]]  ;;  %s486_s30 = sld [smem:[#allocation2 + $0x2b]] }
  0x25   :  { %v122_v62 = vstv %s399_s14  ;;  %v128_v63 = vstv %s401_s15  ;;  %v456_v2 = vadd.f32 %v90_v48, %v87_v44  ;;  %v458_v3 = vadd.f32 %v101_v50, %v98_v49  ;;  %s492_s3 = sld [smem:[#allocation2 + $0x26]]  ;;  %s494_s4 = sld [smem:[#allocation2 + $0x2c]] }
  0x26   :  { %v119_v4 = vstv %s395_s13  ;;  %v129_v5 = vmul.f32 %v128_v63, %v329_v0  ;;  %v130_v6 = vstv %s407_s16  ;;  %v133_v7 = vstv %s409_s17  ;;  %s502_s1 = sld [smem:[#allocation2 + $0x27]]  ;;  %s504_s5 = sld [smem:[#allocation2 + $0x2d]] }
  0x27   :  { %v139_v8 = vstv %s418_s18  ;;  %v141_v9 = vstv %s416_s0  ;;  %v474_v10 = vadd.f32 %v112_v59, %v109_v58  ;;  %v123_v11 = vmul.f32 %v346_v1, %v122_v62  ;;  %s513_s6 = sld [smem:[#allocation2 + $0x2e]]  ;;  %s521_s7 = sld [smem:[#allocation2 + $0x2f]] }
  0x28   :  { %v140_v0 = vmul.f32 %v139_v8, %v37_v52  ;;  %v144_v12 = vstv %s427_s19  ;;  %v120_v13 = vadd.f32 %v119_v4, %v118_v61  ;;  %v148_v15 = vstv %s432_s20  ;;  %s283_s8 = sld [smem:[#allocation2 + $0x30]]  ;;  %s284_s9 = sld [smem:[#allocation2 + $0x31]] }
  0x29   :  { %v145_v14 = vmul.f32 %v144_v12, %v48_v53  ;;  %v152_v16 = vstv %s434_s21  ;;  %v131_v17 = vadd.f32 %v130_v6, %v129_v5  ;;  %v134_v18 = vmul.f32 %v346_v1, %v133_v7 }
  0x2a   :  { %v142_v19 = vadd.f32 %v141_v9, %v140_v0  ;;  %v149_v20 = vmul.f32 %v148_v15, %v59_v56  ;;  %v156_v21 = vstv %s443_s22  ;;  %v92_v22 = vmax.f32 %v456_v2, 0.0 }
  0x2b   :  { %v153_v1 = vmul.f32 %v152_v16, %v70_v57  ;;  %v103_v24 = vmax.f32 %v458_v3, 0.0  ;;  %v114_v25 = vmax.f32 %v474_v10, 0.0  ;;  %v124_v26 = vadd.f32 %v123_v11, %v120_v13 }
  0x2c   :  { %v146_v23 = vadd.f32 %v145_v14, %v142_v19  ;;  %v160_v27 = vstv %s452_s23  ;;  %v135_v28 = vadd.f32 %v134_v18, %v131_v17  ;;  %v157_v30 = vmul.f32 %v156_v21, %v81_v60 }
  0x2d   :  { %v164_v31 = vstv %s454_s24  ;;  %v186_v32 = vstv %s464_s26  ;;  %v188_v34 = vstv %s462_s25  ;;  %v191_v35 = vstv %s470_s27 }
  0x2e   :  { %v150_v29 = vadd.f32 %v149_v20, %v146_v23  ;;  %v195_v37 = vstv %s472_s28  ;;  %v161_v39 = vmul.f32 %v160_v27, %v92_v22  ;;  %v187_v43 = vmul.f32 %v186_v32, %v37_v52 }
  0x2f   :  { %v192_v44 = vmul.f32 %v191_v35, %v48_v53  ;;  %v125_v45 = vmax.f32 %v124_v26, 0.0  ;;  %v168_v46 = vstv %s484_s29  ;;  %v199_v47 = vstv %s486_s30 }
  0x30   :  { %v154_v38 = vadd.f32 %v153_v1, %v150_v29  ;;  %v165_v49 = vmul.f32 %v164_v31, %v103_v24  ;;  %v189_v50 = vadd.f32 %v188_v34, %v187_v43  ;;  %v196_v51 = vmul.f32 %v195_v37, %v59_v56 }
  0x31   :  { %v136_v54 = vmax.f32 %v135_v28, 0.0  ;;  %v172_v33 = vstv %s492_s3  ;;  %v203_v52 = vstv %s494_s4  ;;  %v169_v53 = vmul.f32 %v168_v46, %v114_v25 }
  0x32   :  { %v158_v48 = vadd.f32 %v157_v30, %v154_v38  ;;  %v193_v55 = vadd.f32 %v192_v44, %v189_v50  ;;  %v200_v58 = vmul.f32 %v199_v47, %v70_v57  ;;  %v176_v59 = vstv %s502_s1 }
  0x33   :  { %v207_v61 = vstv %s504_s5  ;;  %v173_v63 = vmul.f32 %v172_v33, %v125_v45  ;;  %v204_v40 = vmul.f32 %v203_v52, %v81_v60  ;;  %v179_v56 = vlaneseq }
  0x34   :  { %v162_v36 = vadd.f32 %v161_v39, %v158_v48  ;;  %v197_v2 = vadd.f32 %v196_v51, %v193_v55  ;;  %v211_v3 = vstv %s513_s6  ;;  %v177_v5 = vmul.f32 %v176_v59, %v136_v54 }
  0x35   :  { %v208_v7 = vmul.f32 %v207_v61, %v92_v22  ;;  %v215_v8 = vstv %s521_s7  ;;  %v212_v41 = vmul.f32 %v211_v3, %v103_v24  ;;  %vm181_vm0 = vcmp.lt.s32.totalorder %v179_v56, 256 }
  0x36   :  { %v166_v62 = vadd.f32 %v165_v49, %v162_v36  ;;  %v201_v6 = vadd.f32 %v200_v58, %v197_v2  ;;  %v219_v57 = vstv %s283_s8  ;;  %v216_v12 = vmul.f32 %v215_v8, %v114_v25 }
  0x37   :  { %v223_v13 = vstv %s284_s9  ;;  %v220_v60 = vmul.f32 %v219_v57, %v125_v45 }
  0x38   :  { %v170_v4 = vadd.f32 %v169_v53, %v166_v62  ;;  %v205_v10 = vadd.f32 %v204_v40, %v201_v6  ;;  %v224_v15 = vmul.f32 %v223_v13, %v136_v54 }
  0x3a   :  { %v174_v9 = vadd.f32 %v173_v63, %v170_v4  ;;  %v209_v0 = vadd.f32 %v208_v7, %v205_v10 }
  0x3c   :  { %v178_v11 = vadd.f32 %v177_v5, %v174_v9  ;;  %v213_v42 = vadd.f32 %v212_v41, %v209_v0 }
  0x3e   :  { %183 = vst.msk [vmem:[%s543_s2] ss:$2 sm:$0x3] %vm181_vm0, %v178_v11  ;;  %v217_v14 = vadd.f32 %v216_v12, %v213_v42 }
  0x40   :  { %v221_v16 = vadd.f32 %v220_v60, %v217_v14 }
  0x42   :  { %v225_v17 = vadd.f32 %v224_v15, %v221_v16 }
  0x44   :  { %285 = vst.msk [vmem:[%s543_s2 + $0x1] ss:$2 sm:$0x3] %vm181_vm0, %v225_v17 }
  0x45   :  { %232 = vsyncpa [#allocation3], 1 }

</bundles_post_ra>
